<compile_context>
chip_gen: v7x
topology: tpu7x:2x2x1
jax: 0.10.0
libtpu: 0.0.40
codegen_flags: <defaults>
</compile_context>

<pallas_src>
import jax
import jax.numpy as jnp
from jax.experimental import pallas as pl
from jax.experimental.pallas import tpu as pltpu

_LANE = 128
_HID = 10                        # fc0 output width (fixed by the module)
_TILE_BYTES = 4 * 1024 * 1024    # target bytes of x per grid step (>= 2-4 MiB => HBM-bound,
                                 # not 0.35 us/step launch-overhead-bound)
_MAX_TB = 32 * 1024              # absolute batch-tile cap: 2 x-buffers + intermediates stay
                                 # far below v7x's 32 MiB scoped VMEM default.


def _mlp_kernel(x_ref, w0t_ref, b0_ref, w1_ref, b1_ref, o_ref):
    # x_ref : (tb, the_nums)  natural (batch, features) layout
    # w0t_ref: (the_nums, 10) fc0.weight.T     b0_ref: (10, 1) fc0.bias column
    # w1_ref : (10, 1) fc1.weight column       b1_ref: SMEM (1,) fc1.bias scalar
    # o_ref  : (1, tb) lane-dense output tile (batch on lanes)
    # fc0 on the MXU in natural layout.
    h = jnp.dot(x_ref[...], w0t_ref[...], preferred_element_type=jnp.float32)  # (tb, 10)
    # Relayout only the narrow (tb, 10) intermediate on-chip; everything after is
    # lane-dense with batch on the lane dimension.
    ht = h.T                                                 # (10, tb)
    ht = jnp.maximum(ht + b0_ref[...], 0.0)                  # fc0 bias + ReLU
    # fc1 as VPU broadcast-multiply + sublane reduce (no second MXU trip).
    y = jnp.sum(ht * w1_ref[...], axis=0, keepdims=True) + b1_ref[0]           # (1, tb)
    o_ref[...] = jnp.maximum(y, 0.0).astype(o_ref.dtype)     # lane-dense store


def _forward_one(x, w0t, b0c, w1c, b1):
    batch, the_nums = x.shape
    # Batch tile: large enough that per-step DMA bytes dominate the fixed grid-step
    # overhead, multiple of 128 (lane-dense output), capped for VMEM (v7x: 32 MiB scoped).
    tb = min(_MAX_TB, max(_LANE, (_TILE_BYTES // (the_nums * 4)) // _LANE * _LANE))
    if batch <= tb:
        tb = batch               # single full-array block: legal for any alignment, no pad
    grid = (pl.cdiv(batch, tb),)
    # When batch % tb != 0 the last tile is partial: Pallas masks out-of-bounds output
    # columns on writeback, so no garbage ever reaches the returned array.
    flops = 2 * batch * the_nums * _HID + 4 * batch * _HID
    bytes_accessed = 4 * batch * (the_nums + 1) + 4 * (the_nums * _HID + 2 * _HID + 1)
    out = pl.pallas_call(
        _mlp_kernel,
        out_shape=jax.ShapeDtypeStruct((1, batch), jnp.float32),
        grid=grid,
        in_specs=[
            pl.BlockSpec((tb, the_nums), lambda i: (i, 0)),      # x: batch-tiled, natural layout
            pl.BlockSpec(w0t.shape, lambda i: (0, 0)),           # weights: constant index map
            pl.BlockSpec(b0c.shape, lambda i: (0, 0)),           #   -> resident, never re-DMA'd
            pl.BlockSpec(w1c.shape, lambda i: (0, 0)),
            pl.BlockSpec(memory_space=pltpu.MemorySpace.SMEM),   # fc1 bias scalar in SMEM
        ],
        out_specs=pl.BlockSpec((1, tb), lambda i: (0, i)),       # lane-dense output tiles
        compiler_params=pltpu.CompilerParams(
            # Batch tiles are independent.
            # TODO(synk): on v7x use pltpu.CORE_PARALLEL (or pl.core_map over a 2-core
            # mesh) to shard the batch-tile axis across both TensorCores.
            dimension_semantics=("parallel",),
        ),
        cost_estimate=pl.CostEstimate(
            flops=flops, transcendentals=0, bytes_accessed=bytes_accessed),
    )(x, w0t, b0c, w1c, b1)
    return out.reshape(batch, 1)     # contiguous reshape back to (batch, 1); no relayout


def dummy_model_forward(params, *argv):
    """tuple(relu(fc1(relu(fc0(x)))) for x in argv).

    `params` uses raw nn.Linear shapes:
      fc0.weight (10, the_nums), fc0.bias (10,), fc1.weight (1, 10), fc1.bias (1,)
    """
    if not argv:
        return ()
    fc0_w, fc0_b, fc1_w, fc1_b = params
    the_nums = fc0_w.shape[1]
    assert fc0_w.shape == (_HID, the_nums), fc0_w.shape
    assert fc0_b.shape == (_HID,), fc0_b.shape
    assert fc1_w.shape == (1, _HID), fc1_w.shape
    assert fc1_b.shape == (1,), fc1_b.shape

    # Tiny (10 x the_nums) weight relayouts once per call; negligible vs. x traffic.
    w0t = fc0_w.T.astype(jnp.float32)                 # (the_nums, 10)
    b0c = fc0_b.reshape(_HID, 1).astype(jnp.float32)  # (10, 1)
    w1c = fc1_w.reshape(_HID, 1).astype(jnp.float32)  # (10, 1)
    b1 = fc1_b.astype(jnp.float32)                    # (1,)

    # TODO(synk): optionally stream x in bf16 (halves HBM read on this bandwidth-bound
    # kernel) if the numerics tradeoff is acceptable.
    results = []
    for x in argv:
        assert x.ndim == 2 and x.shape[1] == the_nums, x.shape
        results.append(_forward_one(x.astype(jnp.float32), w0t, b0c, w1c, b1))
    return tuple(results)


def init_params(the_nums, key):
    """Deterministic init mirroring nn.Linear shapes exactly."""
    k0, k1, k2, k3 = jax.random.split(key, 4)
    bound0 = 1.0 / jnp.sqrt(the_nums)
    bound1 = 1.0 / jnp.sqrt(float(_HID))
    fc0_w = jax.random.uniform(k0, (_HID, the_nums), jnp.float32, -bound0, bound0)
    fc0_b = jax.random.uniform(k1, (_HID,), jnp.float32, -bound0, bound0)
    fc1_w = jax.random.uniform(k2, (1, _HID), jnp.float32, -bound1, bound1)
    fc1_b = jax.random.uniform(k3, (1,), jnp.float32, -bound1, bound1)
    return (fc0_w, fc0_b, fc1_w, fc1_b)


if __name__ == "__main__":
    the_nums = 32
    key = jax.random.PRNGKey(0)
    kp, kx1, kx2, kx3 = jax.random.split(key, 4)

    params = init_params(the_nums, kp)
    x1 = jax.random.normal(kx1, (8, the_nums), jnp.float32)
    x2 = jax.random.normal(kx2, (8, the_nums), jnp.float32)
    x3 = jax.random.normal(kx3, (4, the_nums), jnp.float32)   # different batch size

    outs = dummy_model_forward(params, x1, x2, x3)
    outs = jax.block_until_ready(outs)

    # Reference check in plain JAX (PyTorch Linear semantics).
    fc0_w, fc0_b, fc1_w, fc1_b = params
    for x, y in zip((x1, x2, x3), outs):
        h = jnp.maximum(x @ fc0_w.T + fc0_b, 0.0)             # (batch, 10)
        ref = jnp.maximum(h @ fc1_w.T + fc1_b, 0.0)           # (batch, 1)
        assert y.shape == (x.shape[0], 1), y.shape
        assert jnp.allclose(y, ref, atol=1e-5, rtol=1e-5), "mismatch vs reference"

    print("KERNEL_OK")
</pallas_src>

<mosaic_0001>
module attributes {stable_mosaic.version = 11 : i64} {
  func.func @_mlp_kernel(%arg0: i32, %arg1: memref<8x32xf32, #tpu.memory_space<vmem>>, %arg2: memref<32x10xf32, #tpu.memory_space<vmem>>, %arg3: memref<10x1xf32, #tpu.memory_space<vmem>>, %arg4: memref<10x1xf32, #tpu.memory_space<vmem>>, %arg5: memref<1xf32, #tpu.memory_space<smem>>, %arg6: memref<1x8xf32, #tpu.memory_space<vmem>>) attributes {dimension_semantics = [#tpu.dimension_semantics<parallel>], iteration_bounds = array<i64: 1>, scalar_prefetch = 0 : i64, scratch_operands = 0 : i64, tpu.core_type = #tpu.core_type<tc>, window_params = [{transform_indices = @transform_0, window_bounds = array<i64: 8, 32>}, {pipeline_mode = #tpu.pipeline_mode<synchronous>, transform_indices = @transform_1, window_bounds = array<i64: 32, 10>}, {pipeline_mode = #tpu.pipeline_mode<synchronous>, transform_indices = @transform_2, window_bounds = array<i64: 10, 1>}, {pipeline_mode = #tpu.pipeline_mode<synchronous>, transform_indices = @transform_3, window_bounds = array<i64: 10, 1>}, {transform_indices = @transform_4, window_bounds = array<i64: 1>}, {transform_indices = @transform_5, window_bounds = array<i64: 1, 8>}]} {
    %c0 = arith.constant 0 : index
    %c0_0 = arith.constant 0 : index
    %0 = vector.load %arg1[%c0, %c0_0] : memref<8x32xf32, #tpu.memory_space<vmem>>, vector<8x32xf32>
    %c0_1 = arith.constant 0 : index
    %c0_2 = arith.constant 0 : index
    %1 = vector.load %arg2[%c0_1, %c0_2] : memref<32x10xf32, #tpu.memory_space<vmem>>, vector<32x10xf32>
    %cst = arith.constant dense<0.000000e+00> : vector<8x10xf32>
    %2 = tpu.matmul %0, %1, %cst {dimension_numbers = #tpu.dot_dimension_numbers<[1], [0], [0], [1], [0, 0, 1, 1], [], []>} : vector<8x32xf32>, vector<32x10xf32>, vector<8x10xf32> -> vector<8x10xf32>
    %3 = tpu.transpose %2, [1, 0] : vector<8x10xf32> -> vector<10x8xf32>
    %c0_3 = arith.constant 0 : index
    %c0_4 = arith.constant 0 : index
    %4 = vector.load %arg3[%c0_3, %c0_4] : memref<10x1xf32, #tpu.memory_space<vmem>>, vector<10x1xf32>
    %5 = vector.broadcast %4 : vector<10x1xf32> to vector<10x8xf32>
    %6 = arith.addf %3, %5 : vector<10x8xf32>
    %cst_5 = arith.constant 0.000000e+00 : f32
    %7 = vector.broadcast %cst_5 : f32 to vector<10x8xf32>
    %8 = arith.maximumf %6, %7 : vector<10x8xf32>
    %c0_6 = arith.constant 0 : index
    %c0_7 = arith.constant 0 : index
    %9 = vector.load %arg4[%c0_6, %c0_7] : memref<10x1xf32, #tpu.memory_space<vmem>>, vector<10x1xf32>
    %10 = vector.broadcast %9 : vector<10x1xf32> to vector<10x8xf32>
    %11 = arith.mulf %8, %10 : vector<10x8xf32>
    %cst_8 = arith.constant dense<0.000000e+00> : vector<8xf32>
    %12 = vector.multi_reduction <add>, %11, %cst_8 [0] : vector<10x8xf32> to vector<8xf32>
    %13 = vector.shape_cast %12 : vector<8xf32> to vector<1x8xf32>
    %c0_9 = arith.constant 0 : index
    %14 = memref.load %arg5[%c0_9] : memref<1xf32, #tpu.memory_space<smem>>
    %15 = vector.broadcast %14 : f32 to vector<1x8xf32>
    %16 = arith.addf %13, %15 : vector<1x8xf32>
    %cst_10 = arith.constant 0.000000e+00 : f32
    %17 = vector.broadcast %cst_10 : f32 to vector<1x8xf32>
    %18 = arith.maximumf %16, %17 : vector<1x8xf32>
    %c0_11 = arith.constant 0 : index
    %c0_12 = arith.constant 0 : index
    %19 = vector.load %arg6[%c0_11, %c0_12] : memref<1x8xf32, #tpu.memory_space<vmem>>, vector<1x8xf32>
    tpu.vector_store %arg6[%c0_11, %c0_12], %18 {strides = array<i32>} : memref<1x8xf32, #tpu.memory_space<vmem>>, vector<1x8xf32>,
    return
  }
  func.func @transform_0(%arg0: i32) -> (i32, i32) {
    %c0_i32 = arith.constant 0 : i32
    %c0_i32_0 = arith.constant 0 : i32
    return %arg0, %c0_i32 : i32, i32
  }
  func.func @transform_1(%arg0: i32) -> (i32, i32) {
    %c0_i32 = arith.constant 0 : i32
    %c0_i32_0 = arith.constant 0 : i32
    %c0_i32_1 = arith.constant 0 : i32
    return %c0_i32, %c0_i32_0 : i32, i32
  }
  func.func @transform_2(%arg0: i32) -> (i32, i32) {
    %c0_i32 = arith.constant 0 : i32
    %c0_i32_0 = arith.constant 0 : i32
    %c0_i32_1 = arith.constant 0 : i32
    return %c0_i32, %c0_i32_0 : i32, i32
  }
  func.func @transform_3(%arg0: i32) -> (i32, i32) {
    %c0_i32 = arith.constant 0 : i32
    %c0_i32_0 = arith.constant 0 : i32
    %c0_i32_1 = arith.constant 0 : i32
    return %c0_i32, %c0_i32_0 : i32, i32
  }
  func.func @transform_4(%arg0: i32) -> i32 {
    %c0_i32 = arith.constant 0 : i32
    %c0_i32_0 = arith.constant 0 : i32
    return %c0_i32 : i32
  }
  func.func @transform_5(%arg0: i32) -> (i32, i32) {
    %c0_i32 = arith.constant 0 : i32
    %c0_i32_0 = arith.constant 0 : i32
    return %c0_i32, %arg0 : i32, i32
  }
}

</mosaic_0001>

<bundles_post_ra>
// kernel: tpu_custom_call.1
= control target key start
LH: loop header
LB: loop body
LE: loop exit
PB: predicated region body
PF: predicated region fallthrough
CT: control target
= control target key end

     0   :  { %v248_v3 = vmov 0.0|0.0   ;;  %vm249_vm0 = vmmov 0   ;;  %v250_v6 = vmov 0.0   ;;  %v251_v8 = vmov 0   ;;  %s325_s0 = inlined_call_operand.vmem [shape: f32[8,32], index: 0, kind: input, shape index: {}]   ;;  %s326_s1 = inlined_call_operand.vmem [shape: f32[32,10], index: 1, kind: input, shape index: {}]   ;;  %s327_s2 = inlined_call_operand.vmem [shape: f32[10,1], index: 2, kind: input, shape index: {}]   ;;  %s328_s3 = inlined_call_operand.vmem [shape: f32[10,1], index: 3, kind: input, shape index: {}]   ;;  %s329_s4 = inlined_call_operand.<no memory space> [shape: f32[1], index: 4, kind: input, shape index: {}]   ;;  %s330_s5 = inlined_call_operand.hbm [shape: f32[1,8], index: 5, kind: output, shape index: {}]  }
   0x1   :  { %v23_v0 = vld [vmem:[%s326_s1] sm:$0xff]  ;;  %v24_v1 = vld [vmem:[%s326_s1 + $0x8] sm:$0xff]  ;;  %v25_v2 = vld [vmem:[%s326_s1 + $0x10] sm:$0xff]  ;;  %211 = vmatprep.subr.bf16.mxu0 %v248_v3  ;;  %208 = vmatprep.mubr.msk.f32.mxu0 %vm249_vm0, %v250_v6 }
   0x2   :  { %v212_v4 = vpack.c.bf16 %v24_v1, %v23_v0  ;;  %v26_v5 = vld [vmem:[%s326_s1 + $0x18] sm:$0xff]  ;;  %v133_v7 = vld [vmem:[%s327_s2] sm:$0xff]  ;;  %222 = vset.pattern.permute.xlu0 %v251_v8  ;;  %223 = vset.pattern.permute.xlu1 %v251_v8 }
   0x3   :  { %11 = vsyncpa [#allocation4], 0  ;;  %v215_v9 = vpack.c.bf16 %v26_v5, %v25_v2  ;;  %137 = vperm.xlu0 %222, %v133_v7   ;;  %v134_v10 = vld [vmem:[%s327_s2 + $0x8] sm:$0x3]  ;;  %v22_v11 = vld [vmem:[%s325_s0] sm:$0xff]  ;;  %vm27_vm1 = vcmask 261120   ;;  %v175_v36 = vstv %s329_s4 }
   0x4   :  { %213 = vmatpush3.bf16.msra.mxu0 %v212_v4  ;;  %v149_v12 = vld [vmem:[%s328_s3] sm:$0xff]  ;;  %v150_v13 = vld [vmem:[%s328_s3 + $0x8] sm:$0x3]  ;;  %vm163_vm2 = vcmask 64512   ;;  %vm165_vm3 = vcmask 58368   ;;  %s252_s3 = smov [#allocation3]  }
   0x5   :  { %214 = vmatprep.subr.bf16.mxu0 %v248_v3  ;;  %153 = vperm.xlu1 %223, %v149_v12   ;;  %s186_s10 = sshll.u32 %s252_s3, 4  ;;  %vm178_vm4 = vcmask 57344   ;;  %s187_s10 = int_to_ptr.vmem [resolvable:$true] %s186_s10 }
   0x6   :  { %s224_s11 = scalar_lea.vmem %s187_s10, 16  ;;  %s228_s12 = scalar_lea.vmem %s187_s10, 32 }
   0x7   :  { %142 = vperm.xlu0 %222, %v134_v10   ;;  %p225_p0 = scmp.ne.s32.totalorder %s187_s10, %s224_s11  ;;  %p229_p1 = scmp.lt.s32.totalorder %s187_s10, %s187_s10 }
   0x8   :  { %216 = vmatpush3.bf16.msra.mxu0 %v215_v9  ;;  %p230_p2 = scmp.lt.s32.totalorder %s228_s12, %s224_s11 }
   0x9   :  { %158 = vperm.xlu1 %223, %v150_v13  }
   0xa   :  { %p231_p3 = por %p230_p2, %p229_p1 }
   0xb   :  { %209 = vmatmul.mubr.msk.f32.vlgmr.msra.gmra.mrb[0].mxu0 %vm27_vm1, %v22_v11 }
   0xc   :  { %p232_p4 = pnand %p231_p3, %p225_p0 }
  0x82   :  { %v138_v16 = vpop.permute.xlu0 %137 }
  0x84   :  { %v154_v20 = vpop.permute.xlu1 %153 }
  0x86   :  { %v143_v17 = vpop.permute.xlu0 %142 }
  0x88   :  { %v159_v26 = vpop.permute.xlu1 %158 }
  0xde   :  { %v97_v14 = vpop.f32.mrb[0].mxu0 }
  0xdf   :  { %101 = vxpose.xlu0.b32.start.end [1/1] (short) (narrow) %v97_v14, 16  ;;  %v210_v15 = vpop.f32.mrb[1].mxu0 }
 0x15f   :  { %v117_v18 = vpop.trf.xlu0 }
 0x160   :  { %v145_v19 = vadd.f32 %v138_v16, %v117_v18 }
 0x162   :  { %v147_v21 = vmax.f32 %v145_v19, 0.0 }
 0x163   :  { %v118_v22 = vpop.trf.xlu0 }
 0x164   :  { %v146_v23 = vadd.f32 %v143_v17, %v118_v22  ;;  %v161_v24 = vmul.f32 %v154_v20, %v147_v21 }
 0x166   :  { %v148_v25 = vmax.f32 %v146_v23, 0.0  ;;  %v164_v28 = vsel %vm163_vm2, %v161_v24, 0.0 }
 0x168   :  { %v162_v27 = vmul.f32 %v159_v26, %v148_v25 }
 0x16a   :  { %v166_v29 = vsel %vm165_vm3, %v162_v27, 0.0 }
 0x16b   :  { %v167_v30 = vadd.f32 %v166_v29, %v164_v28 }
 0x16d   :  { %v168_v31 = vrot.slane %v167_v30, 4 }
 0x16f   :  { %v169_v32 = vadd.f32 %v168_v31, %v167_v30 }
 0x171   :  { %v170_v33 = vrot.slane %v169_v32, 2 }
 0x173   :  { %v171_v34 = vadd.f32 %v170_v33, %v169_v32 }
 0x175   :  { %v172_v35 = vrot.slane %v171_v34, 1 }
 0x177   :  { %v173_v37 = vadd.f32 %v172_v35, %v171_v34 }
 0x179   :  { %v176_v38 = vadd.f32 %v175_v36, %v173_v37 }
 0x17b   :  { %v177_v39 = vmax.f32 %v176_v38, 0.0 }
 0x17d   :  { %179 = vst.msk [vmem:[#allocation3] sm:$0x1] %vm178_vm4, %v177_v39 }
 0x17e   :  { %235 = shalt.err (!%p232_p4)
}
 0x17f   :  { %s236_s4 = scalar_lea.hbm %s330_s5, 16 }
 0x180   :  { %p237_p5 = scmp.ne.s32.totalorder %s330_s5, %s236_s4  ;;  %p240_p6 = scmp.lt.u32.totalorder %s236_s4, %s330_s5 }
 0x182   :  { %p242_p7 = pnand %p240_p6, %p237_p5 }
 0x184   :  { %245 = shalt.err (!%p242_p7)
}
 0x185   :  { %189 = dma.vmem_to_hbm [thread:$0]  %s187_s10, 16, %s330_s5, [#allocation4]  }
 0x186   :  { %246 = dma.done.wait [#allocation4], 16  }
 0x187   :  { %247 = vsyncadd [#allocation4], 4294967280 }
 0x188   :  { %193 = vsyncpa [#allocation4], 1 }

</bundles_post_ra>
